<compile_context>
chip_gen: v6e
topology: v6e:2x2x1
jax: 0.10.0
libtpu: 0.0.40
codegen_flags: <defaults>
</compile_context>

<pallas_src>
import jax
import jax.numpy as jnp
from jax.experimental import pallas as pl
from jax.experimental.pallas import tpu as pltpu


def actor_kernel(x_ref, w1_ref, b1_ref, w2_ref, b2_ref, w3_ref, b3_ref, o_ref):
    # Layer 1: (tb, S_pad) @ (S_pad, 256) + (1, 256) -> tanh
    h1 = jnp.tanh(
        jnp.dot(x_ref[...], w1_ref[...], preferred_element_type=jnp.float32)
        + b1_ref[...]
    )
    # Layer 2: (tb, 256) @ (256, 256) + (1, 256) -> tanh
    h2 = jnp.tanh(
        jnp.dot(h1, w2_ref[...], preferred_element_type=jnp.float32)
        + b2_ref[...]
    )
    # Layer 3: (tb, 256) @ (256, 128) + (1, 128) -> tanh  (lane-padded output)
    o_ref[...] = jnp.tanh(
        jnp.dot(h2, w3_ref[...], preferred_element_type=jnp.float32)
        + b3_ref[...]
    ).astype(o_ref.dtype)


def _round_up(n, m):
    return ((n + m - 1) // m) * m


def actor_forward(x, params, *, tb_max=256):
    """x: (B, state_dim) float32. Returns (B, 2) float32."""
    B, S = x.shape
    w1, b1, w2, b2, w3, b3 = params
    H = w1.shape[1]          # 256
    O = w3.shape[1]          # 2

    # Lane-pad the layer-1 contraction dim (zero x cols / zero W1 rows: no-op).
    S_pad = max(_round_up(S, 128), 128)
    # Lane-pad the 2-wide output to a full 128-lane slab (lane-dense stores).
    O_pad = max(_round_up(O, 128), 128)

    # Batch tiling:
    #  - tiny batch: one 8-aligned tile (grid launch is pure fixed overhead
    #    at this size anyway),
    #  - mid batch: split into >= 2 tiles (128-multiples) so v7x's two
    #    TensorCores both get work,
    #  - large batch: 256-row tiles (matches v6e/v7x 256-wide MXU, and is a
    #    128-multiple for v5e).
    B8 = _round_up(B, 8)
    if B8 <= 128:
        tb = B8
    elif B8 <= 2 * tb_max:
        tb = _round_up((B8 + 1) // 2, 128)
    else:
        tb = tb_max
    B_pad = _round_up(B, tb)

    # Zero padding (done in the wrapper; padded rows/cols do not affect the
    # real outputs and are sliced off below).
    x_p = jnp.pad(x, ((0, B_pad - B), (0, S_pad - S)))
    w1_p = jnp.pad(w1, ((0, S_pad - S), (0, 0)))
    w3_p = jnp.pad(w3, ((0, 0), (0, O_pad - O)))
    b3_p = jnp.pad(b3, ((0, 0), (0, O_pad - O)))

    grid = (B_pad // tb,)
    out = pl.pallas_call(
        actor_kernel,
        out_shape=jax.ShapeDtypeStruct((B_pad, O_pad), jnp.float32),
        grid_spec=pltpu.PrefetchScalarGridSpec(
            num_scalar_prefetch=0,
            grid=grid,
            in_specs=[
                pl.BlockSpec((tb, S_pad), lambda i: (i, 0)),   # x tile over batch
                pl.BlockSpec((S_pad, H), lambda i: (0, 0)),    # W1 (VMEM-resident)
                pl.BlockSpec((1, H), lambda i: (0, 0)),        # b1
                pl.BlockSpec((H, H), lambda i: (0, 0)),        # W2
                pl.BlockSpec((1, H), lambda i: (0, 0)),        # b2
                pl.BlockSpec((H, O_pad), lambda i: (0, 0)),    # W3 (lane-padded)
                pl.BlockSpec((1, O_pad), lambda i: (0, 0)),    # b3 (lane-padded)
            ],
            out_specs=pl.BlockSpec((tb, O_pad), lambda i: (i, 0)),
        ),
        compiler_params=pltpu.CompilerParams(
            dimension_semantics=("parallel",),
            vmem_limit_bytes=64 * 1024 * 1024,
        ),
    )(x_p, w1_p, b1, w2, b2, w3_p, b3_p)

    return out[:B, :O]


def init_params(key, state_dim, hidden=256, out_dim=2):
    """Deterministic init mimicking nn.Linear default (uniform +-1/sqrt(fan_in)).
    Weights stored as (in, out)."""
    def linear(k, fan_in, fan_out):
        kw, kb = jax.random.split(k)
        bound = 1.0 / jnp.sqrt(fan_in)
        w = jax.random.uniform(kw, (fan_in, fan_out), jnp.float32, -bound, bound)
        b = jax.random.uniform(kb, (1, fan_out), jnp.float32, -bound, bound)
        return w, b

    k1, k2, k3 = jax.random.split(key, 3)
    w1, b1 = linear(k1, state_dim, hidden)
    w2, b2 = linear(k2, hidden, hidden)
    w3, b3 = linear(k3, hidden, out_dim)
    return (w1, b1, w2, b2, w3, b3)


def actor_reference(x, params):
    w1, b1, w2, b2, w3, b3 = params
    h = jnp.tanh(x @ w1 + b1)
    h = jnp.tanh(h @ w2 + b2)
    return jnp.tanh(h @ w3 + b3)


if __name__ == "__main__":
    key = jax.random.PRNGKey(0)
    kx, kp = jax.random.split(key)

    # Small shapes consistent with the module spec.
    batch, state_dim = 8, 32
    x = jax.random.normal(kx, (batch, state_dim), jnp.float32)
    params = init_params(kp, state_dim)

    out = actor_forward(x, params)
    out = jax.block_until_ready(out)

    ref = actor_reference(x, params)
    assert out.shape == (batch, 2)
    assert jnp.allclose(out, ref, atol=1e-5, rtol=1e-5)

    # Also exercise the multi-tile (grid > 1) path with a larger, non-aligned
    # batch to make sure padding / tiling logic is correct.
    xb = jax.random.normal(kx, (300, state_dim), jnp.float32)
    outb = jax.block_until_ready(actor_forward(xb, params))
    refb = actor_reference(xb, params)
    assert outb.shape == (300, 2)
    assert jnp.allclose(outb, refb, atol=1e-5, rtol=1e-5)

    print("KERNEL_OK")
</pallas_src>

<mosaic_0001>
module attributes {stable_mosaic.version = 11 : i64} {
  func.func @actor_kernel(%arg0: i32, %arg1: memref<8x128xf32, #tpu.memory_space<vmem>>, %arg2: memref<128x256xf32, #tpu.memory_space<vmem>>, %arg3: memref<1x256xf32, #tpu.memory_space<vmem>>, %arg4: memref<256x256xf32, #tpu.memory_space<vmem>>, %arg5: memref<1x256xf32, #tpu.memory_space<vmem>>, %arg6: memref<256x128xf32, #tpu.memory_space<vmem>>, %arg7: memref<1x128xf32, #tpu.memory_space<vmem>>, %arg8: memref<8x128xf32, #tpu.memory_space<vmem>>) attributes {dimension_semantics = [#tpu.dimension_semantics<parallel>], iteration_bounds = array<i64: 1>, scalar_prefetch = 0 : i64, scratch_operands = 0 : i64, tpu.core_type = #tpu.core_type<tc>, window_params = [{transform_indices = @transform_0, window_bounds = array<i64: 8, 128>}, {pipeline_mode = #tpu.pipeline_mode<synchronous>, transform_indices = @transform_1, window_bounds = array<i64: 128, 256>}, {pipeline_mode = #tpu.pipeline_mode<synchronous>, transform_indices = @transform_2, window_bounds = array<i64: 1, 256>}, {pipeline_mode = #tpu.pipeline_mode<synchronous>, transform_indices = @transform_3, window_bounds = array<i64: 256, 256>}, {pipeline_mode = #tpu.pipeline_mode<synchronous>, transform_indices = @transform_4, window_bounds = array<i64: 1, 256>}, {pipeline_mode = #tpu.pipeline_mode<synchronous>, transform_indices = @transform_5, window_bounds = array<i64: 256, 128>}, {pipeline_mode = #tpu.pipeline_mode<synchronous>, transform_indices = @transform_6, window_bounds = array<i64: 1, 128>}, {transform_indices = @transform_7, window_bounds = array<i64: 8, 128>}]} {
    %c0 = arith.constant 0 : index
    %c0_0 = arith.constant 0 : index
    %0 = vector.load %arg1[%c0, %c0_0] : memref<8x128xf32, #tpu.memory_space<vmem>>, vector<8x128xf32>
    %c0_1 = arith.constant 0 : index
    %c0_2 = arith.constant 0 : index
    %1 = vector.load %arg2[%c0_1, %c0_2] : memref<128x256xf32, #tpu.memory_space<vmem>>, vector<128x256xf32>
    %cst = arith.constant dense<0.000000e+00> : vector<8x256xf32>
    %2 = tpu.matmul %0, %1, %cst {dimension_numbers = #tpu.dot_dimension_numbers<[1], [0], [0], [1], [0, 0, 1, 1], [], []>} : vector<8x128xf32>, vector<128x256xf32>, vector<8x256xf32> -> vector<8x256xf32>
    %c0_3 = arith.constant 0 : index
    %c0_4 = arith.constant 0 : index
    %3 = vector.load %arg3[%c0_3, %c0_4] : memref<1x256xf32, #tpu.memory_space<vmem>>, vector<1x256xf32>
    %4 = vector.broadcast %3 : vector<1x256xf32> to vector<8x256xf32>
    %5 = arith.addf %2, %4 : vector<8x256xf32>
    %6 = math.tanh %5 : vector<8x256xf32>
    %c0_5 = arith.constant 0 : index
    %c0_6 = arith.constant 0 : index
    %7 = vector.load %arg4[%c0_5, %c0_6] : memref<256x256xf32, #tpu.memory_space<vmem>>, vector<256x256xf32>
    %cst_7 = arith.constant dense<0.000000e+00> : vector<8x256xf32>
    %8 = tpu.matmul %6, %7, %cst_7 {dimension_numbers = #tpu.dot_dimension_numbers<[1], [0], [0], [1], [0, 0, 1, 1], [], []>} : vector<8x256xf32>, vector<256x256xf32>, vector<8x256xf32> -> vector<8x256xf32>
    %c0_8 = arith.constant 0 : index
    %c0_9 = arith.constant 0 : index
    %9 = vector.load %arg5[%c0_8, %c0_9] : memref<1x256xf32, #tpu.memory_space<vmem>>, vector<1x256xf32>
    %10 = vector.broadcast %9 : vector<1x256xf32> to vector<8x256xf32>
    %11 = arith.addf %8, %10 : vector<8x256xf32>
    %12 = math.tanh %11 : vector<8x256xf32>
    %c0_10 = arith.constant 0 : index
    %c0_11 = arith.constant 0 : index
    %13 = vector.load %arg6[%c0_10, %c0_11] : memref<256x128xf32, #tpu.memory_space<vmem>>, vector<256x128xf32>
    %cst_12 = arith.constant dense<0.000000e+00> : vector<8x128xf32>
    %14 = tpu.matmul %12, %13, %cst_12 {dimension_numbers = #tpu.dot_dimension_numbers<[1], [0], [0], [1], [0, 0, 1, 1], [], []>} : vector<8x256xf32>, vector<256x128xf32>, vector<8x128xf32> -> vector<8x128xf32>
    %c0_13 = arith.constant 0 : index
    %c0_14 = arith.constant 0 : index
    %15 = vector.load %arg7[%c0_13, %c0_14] : memref<1x128xf32, #tpu.memory_space<vmem>>, vector<1x128xf32>
    %16 = vector.broadcast %15 : vector<1x128xf32> to vector<8x128xf32>
    %17 = arith.addf %14, %16 : vector<8x128xf32>
    %18 = math.tanh %17 : vector<8x128xf32>
    %c0_15 = arith.constant 0 : index
    %c0_16 = arith.constant 0 : index
    %19 = vector.load %arg8[%c0_15, %c0_16] : memref<8x128xf32, #tpu.memory_space<vmem>>, vector<8x128xf32>
    tpu.vector_store %arg8[%c0_15, %c0_16], %18 {strides = array<i32>} : memref<8x128xf32, #tpu.memory_space<vmem>>, vector<8x128xf32>,
    return
  }
  func.func @transform_0(%arg0: i32) -> (i32, i32) {
    %c0_i32 = arith.constant 0 : i32
    %c0_i32_0 = arith.constant 0 : i32
    return %arg0, %c0_i32 : i32, i32
  }
  func.func @transform_1(%arg0: i32) -> (i32, i32) {
    %c0_i32 = arith.constant 0 : i32
    %c0_i32_0 = arith.constant 0 : i32
    %c0_i32_1 = arith.constant 0 : i32
    return %c0_i32, %c0_i32_0 : i32, i32
  }
  func.func @transform_2(%arg0: i32) -> (i32, i32) {
    %c0_i32 = arith.constant 0 : i32
    %c0_i32_0 = arith.constant 0 : i32
    %c0_i32_1 = arith.constant 0 : i32
    return %c0_i32, %c0_i32_0 : i32, i32
  }
  func.func @transform_3(%arg0: i32) -> (i32, i32) {
    %c0_i32 = arith.constant 0 : i32
    %c0_i32_0 = arith.constant 0 : i32
    %c0_i32_1 = arith.constant 0 : i32
    return %c0_i32, %c0_i32_0 : i32, i32
  }
  func.func @transform_4(%arg0: i32) -> (i32, i32) {
    %c0_i32 = arith.constant 0 : i32
    %c0_i32_0 = arith.constant 0 : i32
    %c0_i32_1 = arith.constant 0 : i32
    return %c0_i32, %c0_i32_0 : i32, i32
  }
  func.func @transform_5(%arg0: i32) -> (i32, i32) {
    %c0_i32 = arith.constant 0 : i32
    %c0_i32_0 = arith.constant 0 : i32
    %c0_i32_1 = arith.constant 0 : i32
    return %c0_i32, %c0_i32_0 : i32, i32
  }
  func.func @transform_6(%arg0: i32) -> (i32, i32) {
    %c0_i32 = arith.constant 0 : i32
    %c0_i32_0 = arith.constant 0 : i32
    %c0_i32_1 = arith.constant 0 : i32
    return %c0_i32, %c0_i32_0 : i32, i32
  }
  func.func @transform_7(%arg0: i32) -> (i32, i32) {
    %c0_i32 = arith.constant 0 : i32
    %c0_i32_0 = arith.constant 0 : i32
    return %arg0, %c0_i32 : i32, i32
  }
}

</mosaic_0001>

<bundles_post_ra>
// kernel: tpu_custom_call.1
= control target key start
LH: loop header
LB: loop body
LE: loop exit
PB: predicated region body
PF: predicated region fallthrough
CT: control target
= control target key end

     0   :  { %12 = vsyncpa [#allocation3], 0  ;;  %s713_s0 = inlined_call_operand.hbm [shape: f32[8,128], index: 0, kind: input, shape index: {}]   ;;  %s714_s1 = inlined_call_operand.hbm [shape: f32[128,256], index: 1, kind: input, shape index: {}]   ;;  %s715_s2 = inlined_call_operand.vmem [shape: f32[1,256], index: 2, kind: input, shape index: {}]   ;;  %s716_s3 = inlined_call_operand.hbm [shape: f32[256,256], index: 3, kind: input, shape index: {}]   ;;  %s717_s4 = inlined_call_operand.vmem [shape: f32[1,256], index: 4, kind: input, shape index: {}]   ;;  %s718_s5 = inlined_call_operand.hbm [shape: f32[256,128], index: 5, kind: input, shape index: {}]   ;;  %s719_s6 = inlined_call_operand.vmem [shape: f32[1,128], index: 6, kind: input, shape index: {}]   ;;  %s720_s7 = inlined_call_operand.hbm [shape: f32[8,128], index: 7, kind: output, shape index: {}]  }
   0x1   :  { %13 = vsyncpa [#allocation6], 0 }
   0x2   :  { %14 = vsyncpa [#allocation9], 0 }
   0x3   :  { %15 = vsyncpa [#allocation4], 0  ;;  %s639_s24 = smov [#allocation5]  }
   0x4   :  { %s31_s25 = sshll.u32 %s639_s24, 4  ;;  %s32_s25 = int_to_ptr.vmem [resolvable:$true] %s31_s25 }
   0x5   :  { %s539_s26 = scalar_lea.vmem %s32_s25, 4096  ;;  %p544_p1 = scmp.lt.s32.totalorder %s32_s25, %s32_s25 }
   0x6   :  { %p540_p0 = scmp.ne.s32.totalorder %s32_s25, %s539_s26  ;;  %p545_p2 = scmp.lt.s32.totalorder %s539_s26, %s539_s26 }
   0x8   :  { %p546_p3 = por %p545_p2, %p544_p1 }
   0xa   :  { %p547_p4 = pnand %p546_p3, %p540_p0 }
   0xc   :  { %550 = shalt.err (!%p547_p4)
}
   0xd   :  { %s640_s27 = smov 256   ;;  %s641_s28 = smov 16  }
   0xe   :  { %37 = dma.hbm_to_vmem [thread:$0]  %s714_s1, 4096, %s32_s25, [#allocation6], %s640_s27, %s640_s27, %s641_s28  }
   0xf   :  { %s642_s8 = smov [#allocation2]   ;;  %s643_s10 = smov [#allocation7]  }
  0x10   :  { %s22_s9 = sshll.u32 %s642_s8, 4  ;;  %s45_s11 = sshll.u32 %s643_s10, 4  ;;  %s23_s9 = int_to_ptr.vmem [resolvable:$true] %s22_s9  ;;  %s46_s11 = int_to_ptr.vmem [resolvable:$true] %s45_s11 }
  0x11   :  { %s559_s12 = scalar_lea.vmem %s23_s9, 128  ;;  %p564_p6 = scmp.lt.s32.totalorder %s23_s9, %s23_s9 }
  0x12   :  { %p560_p5 = scmp.ne.s32.totalorder %s23_s9, %s559_s12  ;;  %p565_p7 = scmp.lt.s32.totalorder %s559_s12, %s559_s12 }
  0x14   :  { %p566_p8 = por %p565_p7, %p564_p6 }
  0x16   :  { %p567_p9 = pnand %p566_p8, %p560_p5 }
  0x18   :  { %570 = shalt.err (!%p567_p9)
}
  0x19   :  { %25 = dma.hbm_to_vmem [thread:$0]  %s713_s0, 128, %s23_s9, [#allocation3]  }
  0x1a   :  { %s579_s15 = scalar_lea.vmem %s46_s11, 8192  ;;  %p584_p11 = scmp.lt.s32.totalorder %s46_s11, %s46_s11 }
  0x1b   :  { %p580_p10 = scmp.ne.s32.totalorder %s46_s11, %s579_s15  ;;  %p585_p12 = scmp.lt.s32.totalorder %s579_s15, %s579_s15 }
  0x1d   :  { %p586_p13 = por %p585_p12, %p584_p11 }
  0x1f   :  { %p587_p0 = pnand %p586_p13, %p580_p10 }
  0x21   :  { %590 = shalt.err (!%p587_p0)
}
  0x22   :  { %51 = dma.hbm_to_vmem [thread:$0]  %s716_s3, 8192, %s46_s11, [#allocation6], %s640_s27, %s640_s27, %s641_s28  }
  0x23   :  { %s644_s17 = smov [#allocation8]  }
  0x24   :  { %s59_s18 = sshll.u32 %s644_s17, 4  ;;  %s60_s18 = int_to_ptr.vmem [resolvable:$true] %s59_s18 }
  0x25   :  { %s599_s19 = scalar_lea.vmem %s60_s18, 4096  ;;  %p604_p2 = scmp.lt.s32.totalorder %s60_s18, %s60_s18 }
  0x26   :  { %p600_p1 = scmp.ne.s32.totalorder %s60_s18, %s599_s19  ;;  %p605_p3 = scmp.lt.s32.totalorder %s599_s19, %s599_s19 }
  0x28   :  { %p606_p4 = por %p605_p3, %p604_p2 }
  0x2a   :  { %p607_p5 = pnand %p606_p4, %p600_p1 }
  0x2c   :  { %610 = shalt.err (!%p607_p5)
}
  0x2d   :  { %s645_s0 = smov 128   ;;  %s646_s20 = smov 8  }
  0x2e   :  { %65 = dma.hbm_to_vmem [thread:$0]  %s718_s5, 4096, %s60_s18, [#allocation9], %s645_s0, %s645_s0, %s646_s20  }
  0x2f   :  { %631 = dma.done.wait [#allocation3], 128  }
  0x30   :  { %632 = vsyncadd [#allocation3], 4294967168 }
  0x31   :  { %633 = dma.done.wait [#allocation6], 12288  }
  0x32   :  { %634 = vsyncadd [#allocation6], 4294955008 }
  0x33   :  { %635 = dma.done.wait [#allocation9], 4096  }
  0x34   :  { %636 = vsyncadd [#allocation9], 4294963200  ;;  %v647_v0 = vmov 0.0   ;;  %v112_v1 = vld [vmem:[#allocation5 + $0xf8] sm:$0xff]  ;;  %v111_v2 = vld [vmem:[#allocation5 + $0xf0] sm:$0xff] }
  0x35   :  { %189 = vmatprep.mubr.f32.mxu0 %v647_v0  ;;  %v110_v3 = vld [vmem:[#allocation5 + $0xe8] sm:$0xff]  ;;  %125 = vmatprep.subr.mxu0 %v112_v1  ;;  %v109_v4 = vld [vmem:[#allocation5 + $0xe0] sm:$0xff]  ;;  %v108_v5 = vld [vmem:[#allocation5 + $0xd8] sm:$0xff] }
  0x36   :  { %126 = vmatpush1.msra.mxu0 %v111_v2  ;;  %v107_v6 = vld [vmem:[#allocation5 + $0xd0] sm:$0xff]  ;;  %v106_v7 = vld [vmem:[#allocation5 + $0xc8] sm:$0xff]  ;;  %v105_v8 = vld [vmem:[#allocation5 + $0xc0] sm:$0xff] }
  0x37   :  { %127 = vmatprep.subr.mxu0 %v110_v3  ;;  %v104_v9 = vld [vmem:[#allocation5 + $0xb8] sm:$0xff]  ;;  %v103_v10 = vld [vmem:[#allocation5 + $0xb0] sm:$0xff]  ;;  %v102_v11 = vld [vmem:[#allocation5 + $0xa8] sm:$0xff] }
  0x38   :  { %128 = vmatpush1.msra.mxu0 %v109_v4  ;;  %v101_v12 = vld [vmem:[#allocation5 + $0xa0] sm:$0xff]  ;;  %v100_v13 = vld [vmem:[#allocation5 + $0x98] sm:$0xff]  ;;  %v99_v14 = vld [vmem:[#allocation5 + $0x90] sm:$0xff] }
  0x39   :  { %129 = vmatprep.subr.mxu0 %v108_v5  ;;  %v229_v15 = vld [vmem:[#allocation7 + $0xf8] sm:$0xff]  ;;  %v228_v16 = vld [vmem:[#allocation7 + $0xf0] sm:$0xff]  ;;  %v227_v17 = vld [vmem:[#allocation7 + $0xe8] sm:$0xff] }
  0x3a   :  { %130 = vmatpush1.msra.mxu0 %v107_v6  ;;  %v98_v18 = vld [vmem:[#allocation5 + $0x88] sm:$0xff]  ;;  %274 = vmatprep.subr.mxu1 %v229_v15  ;;  %v226_v19 = vld [vmem:[#allocation7 + $0xe0] sm:$0xff]  ;;  %v225_v21 = vld [vmem:[#allocation7 + $0xd8] sm:$0xff] }
  0x3b   :  { %131 = vmatprep.subr.mxu0 %v106_v7  ;;  %v97_v20 = vld [vmem:[#allocation5 + $0x80] sm:$0xff]  ;;  %275 = vmatpush1.msra.mxu1 %v228_v16  ;;  %v96_v22 = vld [vmem:[#allocation5 + $0x78] sm:$0xff]  ;;  %v224_v23 = vld [vmem:[#allocation7 + $0xd0] sm:$0xff] }
  0x3c   :  { %132 = vmatpush1.msra.mxu0 %v105_v8  ;;  %276 = vmatprep.subr.mxu1 %v227_v17  ;;  %v95_v24 = vld [vmem:[#allocation5 + $0x70] sm:$0xff]  ;;  %v223_v25 = vld [vmem:[#allocation7 + $0xc8] sm:$0xff]  ;;  %v222_v27 = vld [vmem:[#allocation7 + $0xc0] sm:$0xff] }
  0x3d   :  { %133 = vmatprep.subr.mxu0 %v104_v9  ;;  %277 = vmatpush1.msra.mxu1 %v226_v19  ;;  %v94_v26 = vld [vmem:[#allocation5 + $0x68] sm:$0xff]  ;;  %v93_v28 = vld [vmem:[#allocation5 + $0x60] sm:$0xff]  ;;  %v221_v29 = vld [vmem:[#allocation7 + $0xb8] sm:$0xff] }
  0x3e   :  { %134 = vmatpush1.msra.mxu0 %v103_v10  ;;  %278 = vmatprep.subr.mxu1 %v225_v21  ;;  %v92_v30 = vld [vmem:[#allocation5 + $0x58] sm:$0xff]  ;;  %v220_v31 = vld [vmem:[#allocation7 + $0xb0] sm:$0xff]  ;;  %v219_v33 = vld [vmem:[#allocation7 + $0xa8] sm:$0xff] }
  0x3f   :  { %135 = vmatprep.subr.mxu0 %v102_v11  ;;  %279 = vmatpush1.msra.mxu1 %v224_v23  ;;  %v91_v32 = vld [vmem:[#allocation5 + $0x50] sm:$0xff]  ;;  %v90_v34 = vld [vmem:[#allocation5 + $0x48] sm:$0xff]  ;;  %v218_v35 = vld [vmem:[#allocation7 + $0xa0] sm:$0xff] }
  0x40   :  { %136 = vmatpush1.msra.mxu0 %v101_v12  ;;  %280 = vmatprep.subr.mxu1 %v223_v25  ;;  %v89_v36 = vld [vmem:[#allocation5 + $0x40] sm:$0xff]  ;;  %v217_v37 = vld [vmem:[#allocation7 + $0x98] sm:$0xff]  ;;  %v216_v39 = vld [vmem:[#allocation7 + $0x90] sm:$0xff] }
  0x41   :  { %137 = vmatprep.subr.mxu0 %v100_v13  ;;  %281 = vmatpush1.msra.mxu1 %v222_v27  ;;  %v88_v38 = vld [vmem:[#allocation5 + $0x38] sm:$0xff]  ;;  %v87_v40 = vld [vmem:[#allocation5 + $0x30] sm:$0xff]  ;;  %v215_v41 = vld [vmem:[#allocation7 + $0x88] sm:$0xff] }
  0x42   :  { %138 = vmatpush1.msra.mxu0 %v99_v14  ;;  %282 = vmatprep.subr.mxu1 %v221_v29  ;;  %v86_v42 = vld [vmem:[#allocation5 + $0x28] sm:$0xff]  ;;  %v214_v43 = vld [vmem:[#allocation7 + $0x80] sm:$0xff]  ;;  %v213_v45 = vld [vmem:[#allocation7 + $0x78] sm:$0xff] }
  0x43   :  { %139 = vmatprep.subr.mxu0 %v98_v18  ;;  %283 = vmatpush1.msra.mxu1 %v220_v31  ;;  %v85_v44 = vld [vmem:[#allocation5 + $0x20] sm:$0xff]  ;;  %v84_v46 = vld [vmem:[#allocation5 + $0x18] sm:$0xff]  ;;  %v212_v47 = vld [vmem:[#allocation7 + $0x70] sm:$0xff] }
  0x44   :  { %140 = vmatpush1.msra.mxu0 %v97_v20  ;;  %284 = vmatprep.subr.mxu1 %v219_v33  ;;  %v83_v48 = vld [vmem:[#allocation5 + $0x10] sm:$0xff]  ;;  %v211_v49 = vld [vmem:[#allocation7 + $0x68] sm:$0xff]  ;;  %v210_v51 = vld [vmem:[#allocation7 + $0x60] sm:$0xff] }
  0x45   :  { %141 = vmatprep.subr.mxu0 %v96_v22  ;;  %285 = vmatpush1.msra.mxu1 %v218_v35  ;;  %v82_v50 = vld [vmem:[#allocation5 + $0x8] sm:$0xff]  ;;  %v81_v52 = vld [vmem:[#allocation5] sm:$0xff]  ;;  %v209_v53 = vld [vmem:[#allocation7 + $0x58] sm:$0xff] }
  0x46   :  { %142 = vmatpush1.msra.mxu0 %v95_v24  ;;  %286 = vmatprep.subr.mxu1 %v217_v37  ;;  %v80_v54 = vld [vmem:[#allocation2] sm:$0xff]  ;;  %v208_v55 = vld [vmem:[#allocation7 + $0x50] sm:$0xff]  ;;  %v207_v56 = vld [vmem:[#allocation7 + $0x48] sm:$0xff] }
  0x47   :  { %143 = vmatprep.subr.mxu0 %v94_v26  ;;  %287 = vmatpush1.msra.mxu1 %v216_v39  ;;  %v206_v57 = vld [vmem:[#allocation7 + $0x40] sm:$0xff]  ;;  %v205_v58 = vld [vmem:[#allocation7 + $0x38] sm:$0xff]  ;;  %v204_v59 = vld [vmem:[#allocation7 + $0x30] sm:$0xff] }
  0x48   :  { %144 = vmatpush1.msra.mxu0 %v93_v28  ;;  %288 = vmatprep.subr.mxu1 %v215_v41  ;;  %v203_v60 = vld [vmem:[#allocation7 + $0x28] sm:$0xff]  ;;  %v202_v61 = vld [vmem:[#allocation7 + $0x20] sm:$0xff]  ;;  %v201_v62 = vld [vmem:[#allocation7 + $0x18] sm:$0xff] }
  0x49   :  { %145 = vmatprep.subr.mxu0 %v92_v30  ;;  %289 = vmatpush1.msra.mxu1 %v214_v43  ;;  %v200_v63 = vld [vmem:[#allocation7 + $0x10] sm:$0xff]  ;;  %v199_v0 = vld [vmem:[#allocation7 + $0x8] sm:$0xff]  ;;  %v198_v1 = vld [vmem:[#allocation7] sm:$0xff] }
  0x4a   :  { %146 = vmatpush1.msra.mxu0 %v91_v32  ;;  %290 = vmatprep.subr.mxu1 %v213_v45  ;;  %v261_v2 = vld [vmem:[#allocation7 + $0x1f8] sm:$0xff]  ;;  %v260_v3 = vld [vmem:[#allocation7 + $0x1f0] sm:$0xff]  ;;  %v259_v4 = vld [vmem:[#allocation7 + $0x1e8] sm:$0xff] }
  0x4b   :  { %147 = vmatprep.subr.mxu0 %v90_v34  ;;  %291 = vmatpush1.msra.mxu1 %v212_v47  ;;  %v258_v5 = vld [vmem:[#allocation7 + $0x1e0] sm:$0xff]  ;;  %v257_v6 = vld [vmem:[#allocation7 + $0x1d8] sm:$0xff]  ;;  %v256_v7 = vld [vmem:[#allocation7 + $0x1d0] sm:$0xff] }
  0x4c   :  { %148 = vmatpush1.msra.mxu0 %v89_v36  ;;  %292 = vmatprep.subr.mxu1 %v211_v49  ;;  %v255_v8 = vld [vmem:[#allocation7 + $0x1c8] sm:$0xff]  ;;  %v254_v9 = vld [vmem:[#allocation7 + $0x1c0] sm:$0xff]  ;;  %v253_v10 = vld [vmem:[#allocation7 + $0x1b8] sm:$0xff] }
  0x4d   :  { %149 = vmatprep.subr.mxu0 %v88_v38  ;;  %293 = vmatpush1.msra.mxu1 %v210_v51  ;;  %v252_v11 = vld [vmem:[#allocation7 + $0x1b0] sm:$0xff]  ;;  %v251_v12 = vld [vmem:[#allocation7 + $0x1a8] sm:$0xff]  ;;  %v250_v13 = vld [vmem:[#allocation7 + $0x1a0] sm:$0xff] }
  0x4e   :  { %150 = vmatpush1.msra.mxu0 %v87_v40  ;;  %294 = vmatprep.subr.mxu1 %v209_v53  ;;  %v249_v14 = vld [vmem:[#allocation7 + $0x198] sm:$0xff]  ;;  %v248_v15 = vld [vmem:[#allocation7 + $0x190] sm:$0xff]  ;;  %v247_v16 = vld [vmem:[#allocation7 + $0x188] sm:$0xff] }
  0x4f   :  { %151 = vmatprep.subr.mxu0 %v86_v42  ;;  %295 = vmatpush1.msra.mxu1 %v208_v55  ;;  %v246_v17 = vld [vmem:[#allocation7 + $0x180] sm:$0xff]  ;;  %v245_v18 = vld [vmem:[#allocation7 + $0x178] sm:$0xff]  ;;  %v244_v19 = vld [vmem:[#allocation7 + $0x170] sm:$0xff] }
  0x50   :  { %152 = vmatpush1.msra.mxu0 %v85_v44  ;;  %296 = vmatprep.subr.mxu1 %v207_v56  ;;  %v243_v20 = vld [vmem:[#allocation7 + $0x168] sm:$0xff]  ;;  %v242_v21 = vld [vmem:[#allocation7 + $0x160] sm:$0xff]  ;;  %v241_v22 = vld [vmem:[#allocation7 + $0x158] sm:$0xff] }
  0x51   :  { %153 = vmatprep.subr.mxu0 %v84_v46  ;;  %297 = vmatpush1.msra.mxu1 %v206_v57  ;;  %v240_v23 = vld [vmem:[#allocation7 + $0x150] sm:$0xff]  ;;  %v239_v24 = vld [vmem:[#allocation7 + $0x148] sm:$0xff]  ;;  %v238_v25 = vld [vmem:[#allocation7 + $0x140] sm:$0xff]  ;;  %v115_v46 = vlaneseq }
  0x52   :  { %154 = vmatpush1.msra.mxu0 %v83_v48  ;;  %298 = vmatprep.subr.mxu1 %v205_v58  ;;  %v237_v26 = vld [vmem:[#allocation7 + $0x138] sm:$0xff]  ;;  %v236_v27 = vld [vmem:[#allocation7 + $0x130] sm:$0xff]  ;;  %v235_v28 = vld [vmem:[#allocation7 + $0x128] sm:$0xff] }
  0x53   :  { %155 = vmatprep.subr.mxu0 %v82_v50  ;;  %299 = vmatpush1.msra.mxu1 %v204_v59  ;;  %v234_v29 = vld [vmem:[#allocation7 + $0x120] sm:$0xff]  ;;  %v233_v30 = vld [vmem:[#allocation7 + $0x118] sm:$0xff]  ;;  %v232_v31 = vld [vmem:[#allocation7 + $0x110] sm:$0xff]  ;;  %v116_v47 = vshrl.u32 %v115_v46, 7 }
  0x54   :  { %156 = vmatpush1.msra.mxu0 %v81_v52  ;;  %300 = vmatprep.subr.mxu1 %v203_v60  ;;  %v231_v32 = vld [vmem:[#allocation7 + $0x108] sm:$0xff]  ;;  %v230_v33 = vld [vmem:[#allocation7 + $0x100] sm:$0xff]  ;;  %v378_v34 = vld [vmem:[#allocation8 + $0xf8] sm:$0xff] }
  0x55   :  { %190 = vmatmul.mubr.f32.vlgmr.msra.gmra.mxu0 %v80_v54  ;;  %301 = vmatpush1.msra.mxu1 %v202_v61  ;;  %v362_v35 = vld [vmem:[#allocation8 + $0x78] sm:$0xff]  ;;  %v377_v36 = vld [vmem:[#allocation8 + $0xf0] sm:$0xff]  ;;  %v376_v38 = vld [vmem:[#allocation8 + $0xe8] sm:$0xff]  ;;  %v117_v48 = vsub.s32 0, %v116_v47  ;;  %v121_v50 = vsub.s32 1, %v116_v47 }
  0x56   :  { %302 = vmatprep.subr.mxu1 %v201_v62  ;;  %476 = vmatprep.subr.mxu0 %v378_v34  ;;  %v361_v37 = vld [vmem:[#allocation8 + $0x70] sm:$0xff]  ;;  %v360_v39 = vld [vmem:[#allocation8 + $0x68] sm:$0xff]  ;;  %v375_v40 = vld [vmem:[#allocation8 + $0xe0] sm:$0xff] }
  0x57   :  { %303 = vmatpush1.msra.mxu1 %v200_v63  ;;  %477 = vmatpush3.msra.mxu0 %v362_v35  ;;  %v359_v41 = vld [vmem:[#allocation8 + $0x60] sm:$0xff]  ;;  %v374_v42 = vld [vmem:[#allocation8 + $0xd8] sm:$0xff]  ;;  %v373_v44 = vld [vmem:[#allocation8 + $0xd0] sm:$0xff] }
  0x58   :  { %304 = vmatprep.subr.mxu1 %v199_v0  ;;  %478 = vmatprep.subr.mxu0 %v377_v36  ;;  %v358_v43 = vld [vmem:[#allocation8 + $0x58] sm:$0xff]  ;;  %v357_v45 = vld [vmem:[#allocation8 + $0x50] sm:$0xff]  ;;  %v372_v59 = vld [vmem:[#allocation8 + $0xc8] sm:$0xff] }
  0x59   :  { %305 = vmatpush1.msra.mxu1 %v198_v1  ;;  %479 = vmatpush3.msra.mxu0 %v361_v37  ;;  %v113_v49 = vld [vmem:[%s715_s2] sm:$0x3]  ;;  %v356_v60 = vld [vmem:[#allocation8 + $0x48] sm:$0xff]  ;;  %v371_v61 = vld [vmem:[#allocation8 + $0xc0] sm:$0xff] }
  0x5a   :  { %306 = vmatprep.subr.mxu1 %v261_v2  ;;  %480 = vmatprep.subr.mxu0 %v376_v38  ;;  %v118_v51 = vrot.slane %v113_v49, %v117_v48  ;;  %v122_v52 = vrot.slane %v113_v49, %v121_v50  ;;  %v355_v62 = vld [vmem:[#allocation8 + $0x40] sm:$0xff]  ;;  %v370_v63 = vld [vmem:[#allocation8 + $0xb8] sm:$0xff]  ;;  %v369_v1 = vld [vmem:[#allocation8 + $0xb0] sm:$0xff] }
  0x5b   :  { %307 = vmatpush2.msra.mxu1 %v260_v3  ;;  %481 = vmatpush3.msra.mxu0 %v360_v39  ;;  %v354_v0 = vld [vmem:[#allocation8 + $0x38] sm:$0xff]  ;;  %v353_v2 = vld [vmem:[#allocation8 + $0x30] sm:$0xff]  ;;  %v368_v3 = vld [vmem:[#allocation8 + $0xa8] sm:$0xff] }
  0x5c   :  { %308 = vmatprep.subr.mxu1 %v259_v4  ;;  %482 = vmatprep.subr.mxu0 %v375_v40  ;;  %v352_v4 = vld [vmem:[#allocation8 + $0x28] sm:$0xff] }
  0x5d   :  { %309 = vmatpush2.msra.mxu1 %v258_v5  ;;  %483 = vmatpush3.msra.mxu0 %v359_v41  ;;  %v367_v5 = vld [vmem:[#allocation8 + $0xa0] sm:$0xff] }
  0x5e   :  { %310 = vmatprep.subr.mxu1 %v257_v6  ;;  %484 = vmatprep.subr.mxu0 %v374_v42  ;;  %v351_v6 = vld [vmem:[#allocation8 + $0x20] sm:$0xff] }
  0x5f   :  { %311 = vmatpush2.msra.mxu1 %v256_v7  ;;  %485 = vmatpush3.msra.mxu0 %v358_v43  ;;  %v366_v7 = vld [vmem:[#allocation8 + $0x98] sm:$0xff] }
  0x60   :  { %312 = vmatprep.subr.mxu1 %v255_v8  ;;  %486 = vmatprep.subr.mxu0 %v373_v44  ;;  %v350_v8 = vld [vmem:[#allocation8 + $0x18] sm:$0xff] }
  0x61   :  { %313 = vmatpush2.msra.mxu1 %v254_v9  ;;  %487 = vmatpush3.msra.mxu0 %v357_v45  ;;  %v365_v9 = vld [vmem:[#allocation8 + $0x90] sm:$0xff] }
  0x62   :  { %314 = vmatprep.subr.mxu1 %v253_v10  ;;  %488 = vmatprep.subr.mxu0 %v372_v59  ;;  %v349_v10 = vld [vmem:[#allocation8 + $0x10] sm:$0xff] }
  0x63   :  { %315 = vmatpush2.msra.mxu1 %v252_v11  ;;  %489 = vmatpush3.msra.mxu0 %v356_v60  ;;  %v364_v11 = vld [vmem:[#allocation8 + $0x88] sm:$0xff] }
  0x64   :  { %316 = vmatprep.subr.mxu1 %v251_v12  ;;  %490 = vmatprep.subr.mxu0 %v371_v61  ;;  %v348_v12 = vld [vmem:[#allocation8 + $0x8] sm:$0xff] }
  0x65   :  { %317 = vmatpush2.msra.mxu1 %v250_v13  ;;  %491 = vmatpush3.msra.mxu0 %v355_v62  ;;  %v363_v13 = vld [vmem:[#allocation8 + $0x80] sm:$0xff] }
  0x66   :  { %318 = vmatprep.subr.mxu1 %v249_v14  ;;  %492 = vmatprep.subr.mxu0 %v370_v63  ;;  %v347_v14 = vld [vmem:[#allocation8] sm:$0xff] }
  0x67   :  { %319 = vmatpush2.msra.mxu1 %v248_v15  ;;  %493 = vmatpush3.msra.mxu0 %v354_v0  ;;  %v262_v15 = vld [vmem:[%s717_s4] sm:$0x3]  ;;  %s648_s4 = smov [#allocation10]  }
  0x68   :  { %320 = vmatprep.subr.mxu1 %v247_v16  ;;  %494 = vmatprep.subr.mxu0 %v369_v1  ;;  %v267_v16 = vrot.slane %v262_v15, %v117_v48  ;;  %s464_s26 = sshll.u32 %s648_s4, 4  ;;  %s465_s26 = int_to_ptr.vmem [resolvable:$true] %s464_s26 }
  0x69   :  { %321 = vmatpush2.msra.mxu1 %v246_v17  ;;  %495 = vmatpush3.msra.mxu0 %v353_v2  ;;  %v271_v17 = vrot.slane %v262_v15, %v121_v50  ;;  %s611_s27 = scalar_lea.vmem %s465_s26, 128  ;;  %p616_p7 = scmp.lt.s32.totalorder %s465_s26, %s465_s26 }
  0x6a   :  { %322 = vmatprep.subr.mxu1 %v245_v18  ;;  %496 = vmatprep.subr.mxu0 %v368_v3  ;;  %p612_p6 = scmp.ne.s32.totalorder %s465_s26, %s611_s27  ;;  %p617_p8 = scmp.lt.s32.totalorder %s611_s27, %s611_s27 }
  0x6b   :  { %323 = vmatpush2.msra.mxu1 %v244_v19  ;;  %497 = vmatpush3.msra.mxu0 %v352_v4 }
  0x6c   :  { %324 = vmatprep.subr.mxu1 %v243_v20  ;;  %498 = vmatprep.subr.mxu0 %v367_v5  ;;  %p618_p9 = por %p617_p8, %p616_p7 }
  0x6d   :  { %325 = vmatpush2.msra.mxu1 %v242_v21  ;;  %499 = vmatpush3.msra.mxu0 %v351_v6 }
  0x6e   :  { %326 = vmatprep.subr.mxu1 %v241_v22  ;;  %500 = vmatprep.subr.mxu0 %v366_v7  ;;  %p619_p10 = pnand %p618_p9, %p612_p6 }
  0x6f   :  { %327 = vmatpush2.msra.mxu1 %v240_v23  ;;  %501 = vmatpush3.msra.mxu0 %v350_v8 }
  0x70   :  { %328 = vmatprep.subr.mxu1 %v239_v24  ;;  %502 = vmatprep.subr.mxu0 %v365_v9 }
  0x71   :  { %329 = vmatpush2.msra.mxu1 %v238_v25  ;;  %503 = vmatpush3.msra.mxu0 %v349_v10  ;;  %v475_v25 = vld [vmem:[%s719_s6] ss:$0 sm:$0xff] }
  0x72   :  { %330 = vmatprep.subr.mxu1 %v237_v26  ;;  %504 = vmatprep.subr.mxu0 %v364_v11 }
  0x73   :  { %331 = vmatpush2.msra.mxu1 %v236_v27  ;;  %505 = vmatpush3.msra.mxu0 %v348_v12 }
  0x74   :  { %332 = vmatprep.subr.mxu1 %v235_v28  ;;  %506 = vmatprep.subr.mxu0 %v363_v13 }
  0x75   :  { %333 = vmatpush2.msra.mxu1 %v234_v29  ;;  %507 = vmatpush3.msra.mxu0 %v347_v14 }
  0x76   :  { %334 = vmatprep.subr.mxu1 %v233_v30 }
  0x77   :  { %335 = vmatpush2.msra.mxu1 %v232_v31 }
  0x78   :  { %336 = vmatprep.subr.mxu1 %v231_v32 }
  0x79   :  { %337 = vmatpush2.msra.mxu1 %v230_v33 }
 0x115   :  { %v191_v53 = vpop.f32.mrf.mxu0 }
 0x116   :  { %v192_v54 = vadd.f32 %v191_v53, %v118_v51 }
 0x117   :  { %v193_v55 = vpop.f32.mrf.mxu0 }
 0x118   :  { %v194_v56 = vadd.f32 %v193_v55, %v122_v52 }
 0x11a   :  { %521 = vtanh.f32 %v194_v56 }
 0x11b   :  { %523 = vtanh.f32 %v192_v54 }
 0x127   :  { %v522_v57 = vpop.eup %521 }
 0x128   :  { %v524_v58 = vpop.eup %523  ;;  %338 = vmatprep.mubr.f32.mxu1 %v522_v57 }
 0x129   :  { %339 = vmatmul.mubr.f32.vlgmr.msra.gmra.mxu1 %v524_v58 }
 0x1e9   :  { %v340_v18 = vpop.f32.mrf.mxu1 }
 0x1ea   :  { %v341_v19 = vadd.f32 %v340_v18, %v267_v16 }
 0x1eb   :  { %v342_v20 = vpop.f32.mrf.mxu1 }
 0x1ec   :  { %v343_v21 = vadd.f32 %v342_v20, %v271_v17 }
 0x1ee   :  { %525 = vtanh.f32 %v343_v21 }
 0x1ef   :  { %527 = vtanh.f32 %v341_v19 }
 0x1fb   :  { %v526_v22 = vpop.eup %525 }
 0x1fc   :  { %v528_v23 = vpop.eup %527  ;;  %450 = vmatprep.mubr.f32.mxu0 %v526_v22 }
 0x1fd   :  { %451 = vmatmul.mubr.f32.vlgmr.msra.gmra.mxu0 %v528_v23 }
 0x2bd   :  { %v508_v24 = vpop.f32.mrf.mxu0 }
 0x2bf   :  { %v509_v26 = vpop.f32.mrf.mxu0 }
 0x2c0   :  { %v510_v27 = vadd.f32 %v509_v26, %v508_v24 }
 0x2c2   :  { %v453_v28 = vadd.f32 %v510_v27, %v475_v25 }
 0x2c4   :  { %529 = vtanh.f32 %v453_v28 }
 0x2d1   :  { %v530_v29 = vpop.eup %529 }
 0x2d2   :  { %457 = vst [vmem:[#allocation10] sm:$0xff] %v530_v29 }
 0x2d3   :  { %622 = shalt.err (!%p619_p10)
}
 0x2d4   :  { %467 = dma.vmem_to_hbm [thread:$0]  %s465_s26, 128, %s720_s7, [#allocation4]  }
 0x2d5   :  { %637 = dma.done.wait [#allocation4], 128  }
 0x2d6   :  { %638 = vsyncadd [#allocation4], 4294967168 }
 0x2d7   :  { %471 = vsyncpa [#allocation3], 1 }
 0x2d8   :  { %472 = vsyncpa [#allocation6], 1 }
 0x2d9   :  { %473 = vsyncpa [#allocation9], 1 }
 0x2da   :  { %474 = vsyncpa [#allocation4], 1 }

</bundles_post_ra>
